<compile_context>
chip_gen: v7x
topology: tpu7x:2x2x1
jax: 0.10.0
libtpu: 0.0.40
codegen_flags: <defaults>
</compile_context>

<pallas_src>
import functools
import numpy as np
import jax
import jax.numpy as jnp
from jax.experimental import pallas as pl
from jax.experimental.pallas import tpu as pltpu

_SQRT_2_OVER_PI = 0.7978845608028654
_INV_SQRT_2 = 0.7071067811865476


def _gelu(v, approximate):
    if approximate:
        # tanh form: routes through the (otherwise idle) EUP slot instead of a
        # long VALU erf polynomial.
        return 0.5 * v * (1.0 + jnp.tanh(_SQRT_2_OVER_PI * (v + 0.044715 * v * v * v)))
    # PyTorch nn.GELU() default (erf form) — exactness flag.
    return 0.5 * v * (1.0 + jax.lax.erf(v * _INV_SQRT_2))


# ----------------------------- Pallas kernel --------------------------------
def conv_branch_kernel(x_ref, a1_ref, sh1_ref, a2_ref, sh2_ref, a3_ref, sh3_ref,
                       o_ref, acc_ref, *, t_valid, tile_t, need_mask,
                       approximate_gelu):
    j = pl.program_id(1)                     # time-tile index (reduction axis)

    @pl.when(j == 0)
    def _():
        acc_ref[...] = jnp.zeros_like(acc_ref)

    xt = x_ref[0]                                             # (TILE_T, H)
    # conv11 as banded matmul (BN scale pre-folded into a1) + shift + GELU
    y1 = jnp.dot(xt, a1_ref[...], preferred_element_type=jnp.float32) + sh1_ref[...]
    y1 = _gelu(y1, approximate_gelu)                          # (TILE_T, 8H)
    # conv12: dominant (8H x 8H) matmul; operands in matmul_dtype, f32 accum
    a2 = a2_ref[...]
    y2 = jnp.dot(y1.astype(a2.dtype), a2, preferred_element_type=jnp.float32) + sh2_ref[...]
    y2 = _gelu(y2, approximate_gelu)                          # (TILE_T, 8H)

    if need_mask:
        # Zero-padded input rows still produce GELU(shift) != 0 after the two
        # convs, so mask them before the sum to keep the mean unbiased.
        t_local = jax.lax.broadcasted_iota(jnp.int32, (tile_t, 1), 0)
        valid = (j * tile_t + t_local) < t_valid
        y2 = jnp.where(valid, y2, 0.0)

    # Row-sum over the time tile (XLU cross-sublane reduce) into the per-batch
    # accumulator — replaces the old O(B^2*T) averaging matmul.
    acc_ref[...] += jnp.sum(y2, axis=0, keepdims=True)        # (1, 8H)

    @pl.when(j == pl.num_programs(1) - 1)
    def _():
        m = acc_ref[...] * (1.0 / t_valid)                    # mean over T (linear)
        out = jnp.dot(m, a3_ref[...], preferred_element_type=jnp.float32) + sh3_ref[...]
        o_ref[...] = out.reshape(o_ref.shape)                 # (1, 1, H)
    # TODO(synk): nn.Dropout(0.75) is identity in eval mode; not applied here.


# ------------------------------ glue (plain JAX) -----------------------------
def conv_h_to_matrix(w, H):
    """Lower a Conv2d with kernel (K,1), padding ((K-1)//2, 0), stride 1 to a
    banded matrix A of shape (Co*H, Ci*H) s.t. y_flat = A @ x_flat."""
    Co, Ci, K, _ = w.shape
    P = (K - 1) // 2
    h = jnp.arange(H)
    k = h[None, :] - h[:, None] + P                # k[h_out, h_in]
    valid = (k >= 0) & (k < K)
    band = w[:, :, jnp.clip(k, 0, K - 1), 0]       # (Co, Ci, H, H)
    band = jnp.where(valid[None, None], band, 0.0)
    return band.transpose(0, 2, 1, 3).reshape(Co * H, Ci * H)


def _round_up(n, m):
    return ((n + m - 1) // m) * m


def conv_branch_forward(x_nchw, params, *, matmul_dtype=jnp.bfloat16,
                        approximate_gelu=True, tile_t=512):
    B, Cin, H, T = x_nchw.shape
    assert Cin == 1
    Hc = 8 * H
    eps = 1e-5

    tile_t = _round_up(max(int(tile_t), 8), 8)
    TILE_T = min(tile_t, _round_up(T, 8))          # sublane-aligned time tile
    Tpad = _round_up(T, TILE_T)
    J = Tpad // TILE_T
    need_mask = Tpad != T

    s_bn = (params['gamma'] / jnp.sqrt(params['var'] + eps)).astype(jnp.float32)
    sc = jnp.repeat(s_bn, H)                       # per-row BN scale, (8H,)

    A1 = conv_h_to_matrix(params['w11'], H)        # (8H, H)
    A2 = conv_h_to_matrix(params['w12'], H)        # (8H, 8H)
    A3 = conv_h_to_matrix(params['w13'], H)        # (H, 8H)

    # Fold BN scale into weights; transpose so features land on lanes.
    a1t = (A1 * sc[:, None]).T.astype(matmul_dtype)   # (H, 8H)
    a2t = (A2 * sc[:, None]).T.astype(matmul_dtype)   # (8H, 8H)
    a3t = A3.T.astype(jnp.float32)                    # (8H, H), tiny -> keep f32

    # Conv bias + BN shift folded into lane-major row vectors.
    sh1 = jnp.repeat((params['b11'] - params['mean']) * s_bn + params['beta'],
                     H)[None, :].astype(jnp.float32)       # (1, 8H)
    sh2 = jnp.repeat((params['b12'] - params['mean']) * s_bn + params['beta'],
                     H)[None, :].astype(jnp.float32)       # (1, 8H)
    sh3 = jnp.full((1, H), params['b13'][0], jnp.float32)  # (1, H)

    # (B, Tpad, H): per-batch samples on sublanes; stored in matmul_dtype (bf16
    # default) to halve the dominant HBM read.
    xt = x_nchw[:, 0].transpose(0, 2, 1)                   # (B, T, H)
    xt = jnp.pad(xt, ((0, 0), (0, Tpad - T), (0, 0))).astype(matmul_dtype)

    m_bytes = jnp.dtype(matmul_dtype).itemsize
    flops = B * (J * (2 * TILE_T * H * Hc + 2 * TILE_T * Hc * Hc) + 2 * Hc * H)
    transcendentals = 2 * B * Tpad * Hc
    bytes_accessed = (B * Tpad * H * m_bytes + (H * Hc + Hc * Hc) * m_bytes
                      + (Hc * H + 2 * Hc + H) * 4 + B * H * 4)

    # Explicit VMEM budget: double-buffered x tile + resident weights + f32
    # intermediates + accumulator, with generous headroom.
    vmem_est = (2 * TILE_T * H * m_bytes
                + 2 * ((H * Hc + Hc * Hc) * m_bytes + Hc * H * 4 + (2 * Hc + H) * 4)
                + 4 * TILE_T * Hc * 4
                + 8 * Hc * 4 + 2 * 8 * H * 4)
    vmem_limit = int(min(max(3 * vmem_est, 16 * 1024 * 1024), 48 * 1024 * 1024))

    kernel = functools.partial(conv_branch_kernel, t_valid=T, tile_t=TILE_T,
                               need_mask=need_mask,
                               approximate_gelu=approximate_gelu)

    const = lambda b, j: (0, 0)                    # weights stay resident (no re-DMA)
    out = pl.pallas_call(
        kernel,
        out_shape=jax.ShapeDtypeStruct((B, 1, H), jnp.float32),
        grid=(B, J),
        in_specs=[
            pl.BlockSpec((1, TILE_T, H), lambda b, j: (b, j, 0)),   # xt tile
            pl.BlockSpec((H, Hc), const),  pl.BlockSpec((1, Hc), const),   # a1, sh1
            pl.BlockSpec((Hc, Hc), const), pl.BlockSpec((1, Hc), const),   # a2, sh2
            pl.BlockSpec((Hc, H), const),  pl.BlockSpec((1, H), const),    # a3, sh3
        ],
        out_specs=pl.BlockSpec((1, 1, H), lambda b, j: (b, 0, 0)),
        scratch_shapes=[pltpu.VMEM((1, Hc), jnp.float32)],          # per-batch acc
        compiler_params=pltpu.CompilerParams(
            dimension_semantics=("parallel", "arbitrary"),
            vmem_limit_bytes=vmem_limit),
        cost_estimate=pl.CostEstimate(flops=flops,
                                      transcendentals=transcendentals,
                                      bytes_accessed=bytes_accessed),
    )(xt, a1t, sh1, a2t, sh2, a3t, sh3)

    return out[:, :, :, None]                      # (B, 1, C, 1), NCHW like PyTorch


# --------------------------- pure-JAX reference ------------------------------
def conv_branch_ref(x, params):
    def conv(v, w, b, pad):
        y = jax.lax.conv_general_dilated(
            v, w, (1, 1), ((pad, pad), (0, 0)),
            dimension_numbers=('NCHW', 'OIHW', 'NCHW'))
        return y + b[None, :, None, None]

    def bn(v):
        s = params['gamma'] / jnp.sqrt(params['var'] + 1e-5)
        return (v - params['mean'][None, :, None, None]) * s[None, :, None, None] \
            + params['beta'][None, :, None, None]

    def gelu_exact(v):
        return 0.5 * v * (1.0 + jax.lax.erf(v * _INV_SQRT_2))

    y = gelu_exact(bn(conv(x, params['w11'], params['b11'], 4)))
    y = gelu_exact(bn(conv(y, params['w12'], params['b12'], 4)))
    y = conv(y, params['w13'], params['b13'], 0)
    return jnp.mean(y, axis=3, keepdims=True)      # dropout is identity in eval


if __name__ == "__main__":
    key = jax.random.PRNGKey(0)
    ks = jax.random.split(key, 12)
    params = dict(
        w11=0.1 * jax.random.normal(ks[0], (8, 1, 9, 1), jnp.float32),
        b11=0.05 * jax.random.normal(ks[1], (8,), jnp.float32),
        w12=0.1 * jax.random.normal(ks[2], (8, 8, 9, 1), jnp.float32),
        b12=0.05 * jax.random.normal(ks[3], (8,), jnp.float32),
        w13=0.1 * jax.random.normal(ks[4], (1, 8, 1, 1), jnp.float32),
        b13=0.05 * jax.random.normal(ks[5], (1,), jnp.float32),
        gamma=1.0 + 0.1 * jax.random.normal(ks[6], (8,), jnp.float32),
        beta=0.1 * jax.random.normal(ks[7], (8,), jnp.float32),
        mean=0.1 * jax.random.normal(ks[8], (8,), jnp.float32),
        var=1.0 + 0.2 * jax.random.uniform(ks[9], (8,), jnp.float32),
    )

    # Case 1: canonical small shape, f32 operands + exact-erf GELU (parity path).
    B, C, T = 2, 16, 16
    x = jax.random.normal(ks[10], (B, 1, C, T), jnp.float32)
    ref = jax.block_until_ready(conv_branch_ref(x, params))
    out = jax.block_until_ready(
        conv_branch_forward(x, params, matmul_dtype=jnp.float32,
                            approximate_gelu=False))
    assert out.shape == (B, 1, C, 1)
    np.testing.assert_allclose(np.asarray(out), np.asarray(ref),
                               rtol=2e-2, atol=2e-3)

    # Case 2: ragged T (exercises pad-row masking + multi-tile accumulation)
    # with the performance defaults: bf16 MXU operands + tanh (EUP) GELU.
    B2, C2, T2 = 3, 16, 20
    x2 = jax.random.normal(ks[11], (B2, 1, C2, T2), jnp.float32)
    ref2 = jax.block_until_ready(conv_branch_ref(x2, params))
    out2 = jax.block_until_ready(conv_branch_forward(x2, params, tile_t=8))
    assert out2.shape == (B2, 1, C2, 1)
    np.testing.assert_allclose(np.asarray(out2), np.asarray(ref2),
                               rtol=1e-1, atol=2.5e-2)

    print("KERNEL_OK")
</pallas_src>

<mosaic_0001>
module attributes {stable_mosaic.version = 11 : i64} {
  func.func @conv_branch_kernel(%arg0: i32, %arg1: i32, %arg2: memref<1x16x16xf32, #tpu.memory_space<vmem>>, %arg3: memref<16x128xf32, #tpu.memory_space<vmem>>, %arg4: memref<1x128xf32, #tpu.memory_space<vmem>>, %arg5: memref<128x128xf32, #tpu.memory_space<vmem>>, %arg6: memref<1x128xf32, #tpu.memory_space<vmem>>, %arg7: memref<128x16xf32, #tpu.memory_space<vmem>>, %arg8: memref<1x16xf32, #tpu.memory_space<vmem>>, %arg9: memref<1x1x16xf32, #tpu.memory_space<vmem>>, %arg10: memref<1x128xf32, #tpu.memory_space<vmem>>) attributes {dimension_semantics = [#tpu.dimension_semantics<parallel>, #tpu.dimension_semantics<arbitrary>], iteration_bounds = array<i64: 2, 1>, scalar_prefetch = 0 : i64, scratch_operands = 1 : i64, tpu.core_type = #tpu.core_type<tc>, window_params = [{transform_indices = @transform_0, window_bounds = array<i64: 1, 16, 16>}, {pipeline_mode = #tpu.pipeline_mode<synchronous>, transform_indices = @transform_1, window_bounds = array<i64: 16, 128>}, {pipeline_mode = #tpu.pipeline_mode<synchronous>, transform_indices = @transform_2, window_bounds = array<i64: 1, 128>}, {pipeline_mode = #tpu.pipeline_mode<synchronous>, transform_indices = @transform_3, window_bounds = array<i64: 128, 128>}, {pipeline_mode = #tpu.pipeline_mode<synchronous>, transform_indices = @transform_4, window_bounds = array<i64: 1, 128>}, {pipeline_mode = #tpu.pipeline_mode<synchronous>, transform_indices = @transform_5, window_bounds = array<i64: 128, 16>}, {pipeline_mode = #tpu.pipeline_mode<synchronous>, transform_indices = @transform_6, window_bounds = array<i64: 1, 16>}, {transform_indices = @transform_7, window_bounds = array<i64: 1, 1, 16>}]} {
    %c0_i32 = arith.constant 0 : i32
    %0 = arith.cmpi eq, %arg1, %c0_i32 : i32
    %1 = arith.extui %0 : i1 to i32
    %c0_i32_0 = arith.constant 0 : i32
    %2 = arith.cmpi ne, %1, %c0_i32_0 : i32
    scf.if %2 {
      %cst_25 = arith.constant 0.000000e+00 : f32
      %39 = vector.broadcast %cst_25 : f32 to vector<1x128xf32>
      %c0_26 = arith.constant 0 : index
      %c0_27 = arith.constant 0 : index
      %40 = vector.load %arg10[%c0_26, %c0_27] : memref<1x128xf32, #tpu.memory_space<vmem>>, vector<1x128xf32>
      tpu.vector_store %arg10[%c0_26, %c0_27], %39 {strides = array<i32>} : memref<1x128xf32, #tpu.memory_space<vmem>>, vector<1x128xf32>,
    } else {
    }
    %c0 = arith.constant 0 : index
    %c0_1 = arith.constant 0 : index
    %c0_2 = arith.constant 0 : index
    %3 = vector.load %arg2[%c0, %c0_1, %c0_2] : memref<1x16x16xf32, #tpu.memory_space<vmem>>, vector<1x16x16xf32>
    %4 = vector.shape_cast %3 : vector<1x16x16xf32> to vector<16x16xf32>
    %c0_3 = arith.constant 0 : index
    %c0_4 = arith.constant 0 : index
    %5 = vector.load %arg3[%c0_3, %c0_4] : memref<16x128xf32, #tpu.memory_space<vmem>>, vector<16x128xf32>
    %cst = arith.constant dense<0.000000e+00> : vector<16x128xf32>
    %6 = tpu.matmul %4, %5, %cst {dimension_numbers = #tpu.dot_dimension_numbers<[1], [0], [0], [1], [0, 0, 1, 1], [], []>} : vector<16x16xf32>, vector<16x128xf32>, vector<16x128xf32> -> vector<16x128xf32>
    %c0_5 = arith.constant 0 : index
    %c0_6 = arith.constant 0 : index
    %7 = vector.load %arg4[%c0_5, %c0_6] : memref<1x128xf32, #tpu.memory_space<vmem>>, vector<1x128xf32>
    %8 = vector.broadcast %7 : vector<1x128xf32> to vector<16x128xf32>
    %9 = arith.addf %6, %8 : vector<16x128xf32>
    %cst_7 = arith.constant 5.000000e-01 : f32
    %10 = vector.broadcast %cst_7 : f32 to vector<16x128xf32>
    %11 = arith.mulf %10, %9 : vector<16x128xf32>
    %cst_8 = arith.constant 0.707106769 : f32
    %12 = vector.broadcast %cst_8 : f32 to vector<16x128xf32>
    %13 = arith.mulf %9, %12 : vector<16x128xf32>
    %14 = math.erf %13 : vector<16x128xf32>
    %cst_9 = arith.constant 1.000000e+00 : f32
    %15 = vector.broadcast %cst_9 : f32 to vector<16x128xf32>
    %16 = arith.addf %15, %14 : vector<16x128xf32>
    %17 = arith.mulf %11, %16 : vector<16x128xf32>
    %c0_10 = arith.constant 0 : index
    %c0_11 = arith.constant 0 : index
    %18 = vector.load %arg5[%c0_10, %c0_11] : memref<128x128xf32, #tpu.memory_space<vmem>>, vector<128x128xf32>
    %cst_12 = arith.constant dense<0.000000e+00> : vector<16x128xf32>
    %19 = tpu.matmul %17, %18, %cst_12 {dimension_numbers = #tpu.dot_dimension_numbers<[1], [0], [0], [1], [0, 0, 1, 1], [], []>} : vector<16x128xf32>, vector<128x128xf32>, vector<16x128xf32> -> vector<16x128xf32>
    %c0_13 = arith.constant 0 : index
    %c0_14 = arith.constant 0 : index
    %20 = vector.load %arg6[%c0_13, %c0_14] : memref<1x128xf32, #tpu.memory_space<vmem>>, vector<1x128xf32>
    %21 = vector.broadcast %20 : vector<1x128xf32> to vector<16x128xf32>
    %22 = arith.addf %19, %21 : vector<16x128xf32>
    %cst_15 = arith.constant 5.000000e-01 : f32
    %23 = vector.broadcast %cst_15 : f32 to vector<16x128xf32>
    %24 = arith.mulf %23, %22 : vector<16x128xf32>
    %cst_16 = arith.constant 0.707106769 : f32
    %25 = vector.broadcast %cst_16 : f32 to vector<16x128xf32>
    %26 = arith.mulf %22, %25 : vector<16x128xf32>
    %27 = math.erf %26 : vector<16x128xf32>
    %cst_17 = arith.constant 1.000000e+00 : f32
    %28 = vector.broadcast %cst_17 : f32 to vector<16x128xf32>
    %29 = arith.addf %28, %27 : vector<16x128xf32>
    %30 = arith.mulf %24, %29 : vector<16x128xf32>
    %c0_18 = arith.constant 0 : index
    %c0_19 = arith.constant 0 : index
    %31 = vector.load %arg10[%c0_18, %c0_19] : memref<1x128xf32, #tpu.memory_space<vmem>>, vector<1x128xf32>
    %cst_20 = arith.constant dense<0.000000e+00> : vector<128xf32>
    %32 = vector.multi_reduction <add>, %30, %cst_20 [0] : vector<16x128xf32> to vector<128xf32>
    %33 = vector.shape_cast %32 : vector<128xf32> to vector<1x128xf32>
    %34 = arith.addf %31, %33 : vector<1x128xf32>
    %c0_21 = arith.constant 0 : index
    %c0_22 = arith.constant 0 : index
    %35 = vector.load %arg10[%c0_21, %c0_22] : memref<1x128xf32, #tpu.memory_space<vmem>>, vector<1x128xf32>
    tpu.vector_store %arg10[%c0_21, %c0_22], %34 {strides = array<i32>} : memref<1x128xf32, #tpu.memory_space<vmem>>, vector<1x128xf32>,
    %c0_i32_23 = arith.constant 0 : i32
    %36 = arith.cmpi eq, %arg1, %c0_i32_23 : i32
    %37 = arith.extui %36 : i1 to i32
    %c0_i32_24 = arith.constant 0 : i32
    %38 = arith.cmpi ne, %37, %c0_i32_24 : i32
    scf.if %38 {
      %c0_25 = arith.constant 0 : index
      %c0_26 = arith.constant 0 : index
      %39 = vector.load %arg10[%c0_25, %c0_26] : memref<1x128xf32, #tpu.memory_space<vmem>>, vector<1x128xf32>
      %cst_27 = arith.constant 6.250000e-02 : f32
      %40 = vector.broadcast %cst_27 : f32 to vector<1x128xf32>
      %41 = arith.mulf %39, %40 : vector<1x128xf32>
      %c0_28 = arith.constant 0 : index
      %c0_29 = arith.constant 0 : index
      %42 = vector.load %arg7[%c0_28, %c0_29] : memref<128x16xf32, #tpu.memory_space<vmem>>, vector<128x16xf32>
      %cst_30 = arith.constant dense<0.000000e+00> : vector<1x16xf32>
      %43 = tpu.matmul %41, %42, %cst_30 {dimension_numbers = #tpu.dot_dimension_numbers<[1], [0], [0], [1], [0, 0, 1, 1], [], []>} : vector<1x128xf32>, vector<128x16xf32>, vector<1x16xf32> -> vector<1x16xf32>
      %c0_31 = arith.constant 0 : index
      %c0_32 = arith.constant 0 : index
      %44 = vector.load %arg8[%c0_31, %c0_32] : memref<1x16xf32, #tpu.memory_space<vmem>>, vector<1x16xf32>
      %45 = arith.addf %43, %44 : vector<1x16xf32>
      %46 = vector.shape_cast %45 : vector<1x16xf32> to vector<1x1x16xf32>
      %c0_33 = arith.constant 0 : index
      %c0_34 = arith.constant 0 : index
      %c0_35 = arith.constant 0 : index
      %47 = vector.load %arg9[%c0_33, %c0_34, %c0_35] : memref<1x1x16xf32, #tpu.memory_space<vmem>>, vector<1x1x16xf32>
      tpu.vector_store %arg9[%c0_33, %c0_34, %c0_35], %46 {strides = array<i32>} : memref<1x1x16xf32, #tpu.memory_space<vmem>>, vector<1x1x16xf32>,
    } else {
    }
    return
  }
  func.func @transform_0(%arg0: i32, %arg1: i32) -> (i32, i32, i32) {
    %c0_i32 = arith.constant 0 : i32
    %c0_i32_0 = arith.constant 0 : i32
    return %arg0, %arg1, %c0_i32 : i32, i32, i32
  }
  func.func @transform_1(%arg0: i32, %arg1: i32) -> (i32, i32) {
    %c0_i32 = arith.constant 0 : i32
    %c0_i32_0 = arith.constant 0 : i32
    %c0_i32_1 = arith.constant 0 : i32
    return %c0_i32, %c0_i32_0 : i32, i32
  }
  func.func @transform_2(%arg0: i32, %arg1: i32) -> (i32, i32) {
    %c0_i32 = arith.constant 0 : i32
    %c0_i32_0 = arith.constant 0 : i32
    %c0_i32_1 = arith.constant 0 : i32
    return %c0_i32, %c0_i32_0 : i32, i32
  }
  func.func @transform_3(%arg0: i32, %arg1: i32) -> (i32, i32) {
    %c0_i32 = arith.constant 0 : i32
    %c0_i32_0 = arith.constant 0 : i32
    %c0_i32_1 = arith.constant 0 : i32
    return %c0_i32, %c0_i32_0 : i32, i32
  }
  func.func @transform_4(%arg0: i32, %arg1: i32) -> (i32, i32) {
    %c0_i32 = arith.constant 0 : i32
    %c0_i32_0 = arith.constant 0 : i32
    %c0_i32_1 = arith.constant 0 : i32
    return %c0_i32, %c0_i32_0 : i32, i32
  }
  func.func @transform_5(%arg0: i32, %arg1: i32) -> (i32, i32) {
    %c0_i32 = arith.constant 0 : i32
    %c0_i32_0 = arith.constant 0 : i32
    %c0_i32_1 = arith.constant 0 : i32
    return %c0_i32, %c0_i32_0 : i32, i32
  }
  func.func @transform_6(%arg0: i32, %arg1: i32) -> (i32, i32) {
    %c0_i32 = arith.constant 0 : i32
    %c0_i32_0 = arith.constant 0 : i32
    %c0_i32_1 = arith.constant 0 : i32
    return %c0_i32, %c0_i32_0 : i32, i32
  }
  func.func @transform_7(%arg0: i32, %arg1: i32) -> (i32, i32, i32) {
    %c0_i32 = arith.constant 0 : i32
    %c0_i32_0 = arith.constant 0 : i32
    %c0_i32_1 = arith.constant 0 : i32
    return %arg0, %c0_i32, %c0_i32_0 : i32, i32, i32
  }
}

</mosaic_0001>

<bundles_post_ra>
// kernel: tpu_custom_call.1
= control target key start
LH: loop header
LB: loop body
LE: loop exit
PB: predicated region body
PF: predicated region fallthrough
CT: control target
= control target key end

     0   :  { %12 = vsyncpa [#allocation4], 0  ;;  %s1439_s0 = inlined_call_operand.hbm [shape: f32[2,16,16], index: 0, kind: input, shape index: {}]   ;;  %s1440_s1 = inlined_call_operand.vmem [shape: f32[16,128], index: 1, kind: input, shape index: {}]   ;;  %s1441_s2 = inlined_call_operand.vmem [shape: f32[1,128], index: 2, kind: input, shape index: {}]   ;;  %s1442_s3 = inlined_call_operand.vmem [shape: f32[128,128], index: 3, kind: input, shape index: {}]   ;;  %s1443_s4 = inlined_call_operand.vmem [shape: f32[1,128], index: 4, kind: input, shape index: {}]   ;;  %s1444_s5 = inlined_call_operand.vmem [shape: f32[128,16], index: 5, kind: input, shape index: {}]   ;;  %s1445_s6 = inlined_call_operand.vmem [shape: f32[1,16], index: 6, kind: input, shape index: {}]   ;;  %s1446_s7 = inlined_call_operand.hbm [shape: f32[2,1,16], index: 7, kind: output, shape index: {}]  }
   0x1   :  { %14 = vsyncpa [#allocation4 + $0x1], 0 }
   0x2   :  { %15 = vsyncpa [#allocation5], 0 }
   0x3   :  { %17 = vsyncpa [#allocation5 + $0x1], 0  ;;  %s1152_s24 = smov 0   ;;  %s1154_s25 = smov 0  }
   0x4   :  { %s1156_s26 = smov 0   ;;  %s1158_s27 = smov 0  }
   0x5   :  { %s1160_s28 = smov 0   ;;  %s1162_s29 = smov 0  }
   0x6 LB: > { %s723_s30 = sadd.s32 4294967295, %s1103_s29   ;;  %s724_s8 = sadd.s32 4294967294, %s1103_s29   ;;  %s1103_s29 = sphi %s1162_s29, %s23_s29   ;;  %s1099_s28 = sphi %s1160_s28, %s1461_s28   ;;  %s1095_s27 = sphi %s1158_s27, %s1460_s27   ;;  %s1091_s26 = sphi %s1156_s26, %s1459_s26   ;;  %s1087_s25 = sphi %s1154_s25, %s1458_s25   ;;  %s1083_s24 = sphi %s1152_s24, %s1457_s24  }
   0x7   : > { %s35_s9 = sadd.s32 1, %s1099_s28  ;;  %s44_s10 = sadd.s32 1, %s1091_s26 }
   0x8   : > { %p37_p0 = scmp.ge.s32.totalorder %s35_s9, 2  ;;  %p51_p1 = scmp.ne.s32.totalorder %s1091_s26, %s1087_s25 }
   0x9   : > { %p52_p2 = scmp.eq.s32.totalorder %s1103_s29, 0  ;;  %p57_p3 = scmp.ne.s32.totalorder %s1087_s25, %s1083_s24 }
   0xa   : > { %s1463_s9 = smov (%p37_p0, %s35_s9), 0  ;;  %p58_p5 = scmp.eq.s32.totalorder %s723_s30, 0 }
   0xb   : > { %p1193_p4 = por %p52_p2, %p51_p1  ;;  %s39_s12 = ssub.s32 %s1099_s28, %s1463_s9 }
   0xc   : > { %p207_p6 = scmp.eq.s32.totalorder %s723_s30, 1  ;;  %p42_p7 = scmp.eq.s32.totalorder %s39_s12, 0 }
   0xd   : > { %p1199_p8 = por %p58_p5, %p57_p3  ;;  %p213_p10 = scmp.eq.s32.totalorder %s724_s8, 1 }
   0xe   : > { %p1203_p9 = por %p207_p6, %p51_p1  ;;  %p928_p13 = scmp.lt.s32.totalorder %s1103_s29, 2 }
   0xf   : > { %s1208_s15 = scalar_select %p42_p7, %s1091_s26, %s44_s10  }
  0x10   : > { %s1450_s14 = scalar_select %p1203_p9, 1, 0 }
  0x11   : > { %p1210_p11 = por %p213_p10, %p57_p3  ;;  %s251_s17 = sand.u32 1, %s1091_s26  }
  0x12   : > { %s727_s18 = sshll.u32 %s251_s17, 4  ;;  %s739_s19 = sshll.u32 %s1099_s28, 8 }
  0x13   : > { %s1451_s16 = scalar_select %p1210_p11, 1, 0 }
  0x14   : > { %s1221_s22 = scalar_lea.hbm %s1439_s0, %s739_s19  ;;  %s255_s23 = scalar_lea.vmem [#allocation3], %s727_s18 }
  0x15   : > { %s264_s30 = sshll.u32 %s255_s23, 4  ;;  %p1227_p0 = pnand %p928_p13, %p1193_p4  ;;  %s1223_s30 = int_to_ptr.vmem [resolvable:$true] %s264_s30 }
  0x16   : > { %s1232_s10 = scalar_lea.sflag [#allocation4], %s251_s17  ;;  %s991_s12 = scalar_lea.hbm %s1221_s22, 256 }
  0x17   : > { %p992_p2 = scmp.ne.s32.totalorder %s1221_s22, %s991_s12  ;;  %p993_p3 = pneg %p1227_p0 }
  0x18   : > { %s996_s11 = scalar_lea.hbm %s1439_s0, 512  ;;  %p997_p4 = scmp.lt.u32.totalorder %s1221_s22, %s1439_s0 }
  0x19   : > { %p994_p5 = pnand %p993_p3, %p992_p2  ;;  %p998_p7 = scmp.lt.u32.totalorder %s996_s11, %s991_s12 }
  0x1a   : > { %p1000_p13 = scmp.lt.u32.totalorder %s991_s12, %s1221_s22 }
  0x1b   : > { %p995_p6 = pneg %p994_p5  ;;  %p999_p10 = por %p998_p7, %p997_p4 }
  0x1d   : > { %p1001_p12 = por %p1000_p13, %p999_p10 }
  0x1f   : > { %p1002_p1 = pnand %p1001_p12, %p995_p6 }
  0x21   : > { %1005 = shalt.err (!%p1002_p1)
}
  0x22   : > { %s1006_s17 = scalar_lea.vmem %s1223_s30, 256  ;;  %s1105_s23 = smov [#allocation3]  }
  0x23   : > { %p1007_p2 = scmp.ne.s32.totalorder %s1223_s30, %s1006_s17  ;;  %s1011_s18 = sshll.u32 %s1105_s23, 4  ;;  %s1012_s18 = int_to_ptr.vmem [resolvable:$false] %s1011_s18 }
  0x24   : > { %s1013_s19 = scalar_lea.vmem %s1012_s18, 512  ;;  %p1014_p9 = scmp.lt.s32.totalorder %s1223_s30, %s1012_s18 }
  0x25   : > { %p1009_p5 = pnand %p1007_p2, %p993_p3  ;;  %p1015_p4 = scmp.lt.s32.totalorder %s1013_s19, %s1006_s17 }
  0x27   : > { %p1010_p11 = pneg %p1009_p5  ;;  %p1016_p7 = por %p1015_p4, %p1014_p9 }
  0x29   : > { %p1017_p10 = pnand %p1016_p7, %p1010_p11 }
  0x2b   : > { %1020 = shalt.err (!%p1017_p10)
}
  0x2c   : > { %s1106_s12 = smov 128   ;;  %s1107_s11 = smov 8  }
  0x2d   : > { %923 = dma.hbm_to_vmem [thread:$0]  (!%p1227_p0), %s1221_s22, 256, %s1223_s30, %s1232_s10, %s1106_s12, %s1106_s12, %s1107_s11  }
  0x2e   : > { %p272_p12 = scmp.lt.s32.totalorder %s1103_s29, 3  ;;  %p1453_p1 = scmp.ge.s32.totalorder %s1103_s29, 1 }
  0x30   : > { %p273_p3 = pnand %p1453_p1, %p272_p12 }
  0x31   : > { %s1264_s20 = sand.u32 (!%p273_p3), 1, %s1087_s25  }
  0x32   : > { %276 = sbr.rel (%p273_p3) target bundleno = 784 (0x310), region = 48  ;;  %s731_s21 = sshll.u32 (!%p273_p3), %s1264_s20, 4 }
  0x33   : > { %s279_s17 = scalar_lea.sflag (!%p273_p3), [#allocation4], %s1264_s20  ;;  %s282_s23 = scalar_lea.vmem (!%p273_p3), [#allocation3], %s731_s21 }
  0x39   : > { %1074 = dma.done.wait (%p1199_p8), %s279_s17, 256  }
  0x3a   : > { %1076 = vsyncadd (%p1199_p8), %s279_s17, 4294967040  ;;  %vm329_vm0 = vcmask 130048   ;;  %v320_v0 = vld [vmem:[%s1440_s1] sm:$0xff]  ;;  %v321_v1 = vld [vmem:[%s1440_s1 + $0x8] sm:$0xff]  ;;  %v1108_v47 = vmov 0.0|0.0   ;;  %v1109_v57 = vmov 0.0  }
  0x3b   : > { %v318_v2 = vld [vmem:[%s282_s23] sm:$0xff]  ;;  %v856_v3 = vpack.c.bf16 %v321_v1, %v320_v0  ;;  %v319_v12 = vld [vmem:[%s282_s23 + $0x8] sm:$0xff]  ;;  %317 = vst [vmem:[#allocation2] sm:$0x1] %v1109_v57  ;;  %vm1110_vm1 = vmmov 0   ;;  %s736_s10 = sshll.u32 %s1095_s27, 4 }
  0x3c   : > { %783 = vmatprep.mubr.msk.f32.mxu0 %vm329_vm0, %v318_v2  ;;  %v421_v4 = vld [vmem:[%s1442_s3] sm:$0xff]  ;;  %v422_v5 = vld [vmem:[%s1442_s3 + $0x8] sm:$0xff]  ;;  %v423_v7 = vld [vmem:[%s1442_s3 + $0x10] sm:$0xff]  ;;  %s311_s18 = scalar_lea.vmem [#allocation6], %s1264_s20  ;;  %vm631_vm2 = vcmask 122880   ;;  %s1390_s11 = scalar_lea.hbm %s1446_s7, %s736_s10 }
  0x3d   : > { %v860_v6 = vpack.c.bf16 %v422_v5, %v421_v4  ;;  %v424_v8 = vld [vmem:[%s1442_s3 + $0x18] sm:$0xff]  ;;  %857 = vmatprep.subr.bf16.mxu0 %v856_v3  ;;  %v425_v10 = vld [vmem:[%s1442_s3 + $0x20] sm:$0xff]  ;;  %v426_v11 = vld [vmem:[%s1442_s3 + $0x28] sm:$0xff]  ;;  %s646_s19 = sshll.u32 %s311_s18, 4  ;;  %s634_s23 = scalar_lea.sflag [#allocation5], %s1264_s20  ;;  %s1392_s19 = int_to_ptr.vmem [resolvable:$true] %s646_s19 }
  0x3e   : > { %v864_v9 = vpack.c.bf16 %v424_v8, %v423_v7  ;;  %859 = vmatpush3.bf16.msra.mxu0 %v856_v3  ;;  %v868_v13 = vpack.c.bf16 %v426_v11, %v425_v10  ;;  %v427_v14 = vld [vmem:[%s1442_s3 + $0x30] sm:$0xff]  ;;  %v428_v15 = vld [vmem:[%s1442_s3 + $0x38] sm:$0xff]  ;;  %v429_v17 = vld [vmem:[%s1442_s3 + $0x40] sm:$0xff]  ;;  %s1021_s21 = scalar_lea.vmem %s1392_s19, 16  ;;  %p1454_p9 = scmp.ne.s32.totalorder %s1450_s14, 0 }
  0x3f   : > { %861 = vmatprep.subr.bf16.mxu1 %v860_v6  ;;  %v872_v16 = vpack.c.bf16 %v428_v15, %v427_v14  ;;  %v430_v18 = vld [vmem:[%s1442_s3 + $0x48] sm:$0xff]  ;;  %v431_v20 = vld [vmem:[%s1442_s3 + $0x50] sm:$0xff]  ;;  %v432_v21 = vld [vmem:[%s1442_s3 + $0x58] sm:$0xff]  ;;  %892 = vmatprep.subr.bf16.mxu0 %v1108_v47  ;;  %p1022_p8 = scmp.ne.s32.totalorder %s1392_s19, %s1021_s21  ;;  %s1111_s27 = smov [#allocation6]  }
  0x40   : > { %863 = vmatpush3.bf16.msra.mxu1 %v860_v6  ;;  %v876_v19 = vpack.c.bf16 %v430_v18, %v429_v17  ;;  %v880_v22 = vpack.c.bf16 %v432_v21, %v431_v20  ;;  %v433_v23 = vld [vmem:[%s1442_s3 + $0x60] sm:$0xff]  ;;  %v434_v24 = vld [vmem:[%s1442_s3 + $0x68] sm:$0xff]  ;;  %v435_v26 = vld [vmem:[%s1442_s3 + $0x70] sm:$0xff]  ;;  %s1025_s17 = sshll.u32 %s1111_s27, 4  ;;  %s1026_s17 = int_to_ptr.vmem [resolvable:$false] %s1025_s17 }
  0x41   : > { %865 = vmatprep.subr.bf16.mxu1 %v864_v9  ;;  %784 = vmatmul.mubr.msk.f32.vlgmr.msra.gmra.mrb[0].mxu0 %vm329_vm0, %v319_v12  ;;  %v884_v25 = vpack.c.bf16 %v434_v24, %v433_v23  ;;  %v436_v27 = vld [vmem:[%s1442_s3 + $0x78] sm:$0xff]  ;;  %v732_v29 = vld [vmem:[%s1441_s2] ss:$0 sm:$0xff]  ;;  %v545_v45 = vld [vmem:[%s1444_s5 + $0x8] sm:$0xff]  ;;  %p1023_p11 = pnand %p1022_p8, %p1454_p9  ;;  %s1027_s22 = scalar_lea.vmem %s1026_s17, 32 }
  0x42   : > { %v888_v28 = vpack.c.bf16 %v436_v27, %v435_v26  ;;  %v544_v44 = vld [vmem:[%s1444_s5] sm:$0xff]  ;;  %v546_v48 = vld [vmem:[%s1444_s5 + $0x10] sm:$0xff]  ;;  %v547_v49 = vld [vmem:[%s1444_s5 + $0x18] sm:$0xff]  ;;  %853 = vmatprep.mubr.msk.f32.mxu0 %vm1110_vm1, %v1109_v57  ;;  %p1028_p6 = scmp.lt.s32.totalorder %s1392_s19, %s1026_s17  ;;  %p1029_p13 = scmp.lt.s32.totalorder %s1027_s22, %s1021_s21 }
  0x43   : > { %v893_v46 = vpack.c.bf16 %v545_v45, %v544_v44  ;;  %v896_v50 = vpack.c.bf16 %v547_v49, %v546_v48  ;;  %v548_v51 = vld [vmem:[%s1444_s5 + $0x20] sm:$0xff]  ;;  %v549_v52 = vld [vmem:[%s1444_s5 + $0x28] sm:$0xff]  ;;  %v550_v54 = vld [vmem:[%s1444_s5 + $0x30] sm:$0xff]  ;;  %p1024_p0 = pneg %p1023_p11 }
  0x44   : > { %867 = vmatpush3.bf16.msra.mxu1 %v864_v9  ;;  %v899_v53 = vpack.c.bf16 %v549_v52, %v548_v51  ;;  %v551_v55 = vld [vmem:[%s1444_s5 + $0x38] sm:$0xff]  ;;  %v552_v58 = vld [vmem:[%s1444_s5 + $0x40] sm:$0xff]  ;;  %v553_v59 = vld [vmem:[%s1444_s5 + $0x48] sm:$0xff]  ;;  %p1030_p2 = por %p1029_p13, %p1028_p6 }
  0x45   : > { %869 = vmatprep.subr.bf16.mxu1 %v868_v13  ;;  %894 = vmatpush3.bf16.msra.mxu0 %v893_v46  ;;  %v902_v56 = vpack.c.bf16 %v551_v55, %v550_v54  ;;  %v905_v60 = vpack.c.bf16 %v553_v59, %v552_v58  ;;  %v554_v61 = vld [vmem:[%s1444_s5 + $0x50] sm:$0xff]  ;;  %v555_v62 = vld [vmem:[%s1444_s5 + $0x58] sm:$0xff]  ;;  %v556_v63 = vld [vmem:[%s1444_s5 + $0x60] sm:$0xff] }
  0x46   : > { %895 = vmatprep.subr.bf16.mxu0 %v1108_v47  ;;  %v908_v0 = vpack.c.bf16 %v555_v62, %v554_v61  ;;  %v557_v1 = vld [vmem:[%s1444_s5 + $0x68] sm:$0xff]  ;;  %v558_v3 = vld [vmem:[%s1444_s5 + $0x70] sm:$0xff]  ;;  %v559_v4 = vld [vmem:[%s1444_s5 + $0x78] sm:$0xff]  ;;  %p1031_p5 = pnand %p1030_p2, %p1024_p0 }
  0x47   : > { %v911_v2 = vpack.c.bf16 %v557_v1, %v556_v63  ;;  %v914_v5 = vpack.c.bf16 %v559_v4, %v558_v3  ;;  %v735_v6 = vld [vmem:[%s1443_s4] ss:$0 sm:$0xff] }
  0x48   : > { %871 = vmatpush3.bf16.msra.mxu1 %v868_v13  ;;  %v529_v27 = vld [vmem:[#allocation2] sm:$0x1] }
  0x49   : > { %873 = vmatprep.subr.bf16.mxu1 %v872_v16  ;;  %897 = vmatpush3.bf16.msra.mxu0 %v896_v50 }
  0x4a   : > { %898 = vmatprep.subr.bf16.mxu0 %v1108_v47 }
  0x4c   : > { %875 = vmatpush3.bf16.msra.mxu1 %v872_v16 }
  0x4d   : > { %877 = vmatprep.subr.bf16.mxu1 %v876_v19  ;;  %900 = vmatpush3.bf16.msra.mxu0 %v899_v53 }
  0x4e   : > { %901 = vmatprep.subr.bf16.mxu0 %v1108_v47 }
  0x50   : > { %879 = vmatpush3.bf16.msra.mxu1 %v876_v19 }
  0x51   : > { %881 = vmatprep.subr.bf16.mxu1 %v880_v22  ;;  %903 = vmatpush3.bf16.msra.mxu0 %v902_v56 }
  0x52   : > { %904 = vmatprep.subr.bf16.mxu0 %v1108_v47 }
  0x54   : > { %883 = vmatpush3.bf16.msra.mxu1 %v880_v22 }
  0x55   : > { %885 = vmatprep.subr.bf16.mxu1 %v884_v25  ;;  %906 = vmatpush3.bf16.msra.mxu0 %v905_v60 }
  0x56   : > { %907 = vmatprep.subr.bf16.mxu0 %v1108_v47 }
  0x58   : > { %887 = vmatpush3.bf16.msra.mxu1 %v884_v25 }
  0x59   : > { %889 = vmatprep.subr.bf16.mxu1 %v888_v28  ;;  %909 = vmatpush3.bf16.msra.mxu0 %v908_v0 }
  0x5a   : > { %910 = vmatprep.subr.bf16.mxu0 %v1108_v47 }
  0x5c   : > { %891 = vmatpush3.bf16.msra.mxu1 %v888_v28 }
  0x5d   : > { %912 = vmatpush3.bf16.msra.mxu0 %v911_v2 }
  0x5e   : > { %913 = vmatprep.subr.bf16.mxu0 %v1108_v47 }
  0x61   : > { %915 = vmatpush3.bf16.msra.mxu0 %v914_v5 }
 0x114   : > { %v785_v30 = vpop.f32.mrb[0].mxu0 }
 0x115   : > { %v408_v31 = vadd.f32 %v785_v30, %v732_v29  ;;  %v402_v32 = vpop.f32.mrb[1].mxu0 }
 0x116   : > { %v403_v33 = vadd.f32 %v732_v29, %v402_v32  ;;  %v560_v32 = vld [vmem:[%s1445_s6] sm:$0x1] }
 0x117   : > { %v414_v34 = vmul.f32 0.70710677, %v408_v31  ;;  %v412_v41 = vmul.f32 0.5, %v408_v31 }
 0x118   : > { %v413_v35 = vmul.f32 0.70710677, %v403_v33  ;;  %v411_v39 = vmul.f32 0.5, %v403_v33 }
 0x119   : > { %983 = verf.f32 %v414_v34 }
 0x11a   : > { %985 = verf.f32 %v413_v35 }
 0x123   : > { %v984_v36 = vpop.eup %983 }
 0x124   : > { %v986_v37 = vpop.eup %985  ;;  %v418_v38 = vadd.f32 1.0, %v984_v36 }
 0x125   : > { %v417_v40 = vadd.f32 1.0, %v986_v37 }
 0x126   : > { %v420_v43 = vmul.f32 %v418_v38, %v412_v41 }
 0x127   : > { %v419_v42 = vmul.f32 %v417_v40, %v411_v39 }
 0x129   : > { %818 = vmatprep.mubr.f32.mxu1 %v419_v42 }
 0x12a   : > { %819 = vmatmul.mubr.f32.vlgmr.msra.gmra.mrb[0].mxu1 %v420_v43 }
 0x1fd   : > { %v820_v7 = vpop.f32.mrb[0].mxu1 }
 0x1fe   : > { %v516_v8 = vadd.f32 %v820_v7, %v735_v6  ;;  %v510_v9 = vpop.f32.mrb[1].mxu1 }
 0x1ff   : > { %v511_v10 = vadd.f32 %v735_v6, %v510_v9 }
 0x200   : > { %v522_v11 = vmul.f32 0.70710677, %v516_v8  ;;  %v520_v15 = vmul.f32 0.5, %v516_v8 }
 0x201   : > { %v521_v12 = vmul.f32 0.70710677, %v511_v10  ;;  %v519_v17 = vmul.f32 0.5, %v511_v10 }
 0x202   : > { %987 = verf.f32 %v522_v11 }
 0x203   : > { %989 = verf.f32 %v521_v12 }
 0x20c   : > { %v988_v13 = vpop.eup %987 }
 0x20d   : > { %v990_v14 = vpop.eup %989  ;;  %v526_v16 = vadd.f32 1.0, %v988_v13 }
 0x20e   : > { %v525_v18 = vadd.f32 1.0, %v990_v14 }
 0x20f   : > { %v528_v19 = vmul.f32 %v526_v16, %v520_v15 }
 0x210   : > { %v527_v20 = vmul.f32 %v525_v18, %v519_v17 }
 0x212   : > { %v530_v21 = vadd.f32 %v528_v19, %v527_v20 }
 0x214   : > { %v531_v22 = vrot.slane %v530_v21, 4 }
 0x216   : > { %v532_v23 = vadd.f32 %v531_v22, %v530_v21 }
 0x218   : > { %v533_v24 = vrot.slane %v532_v23, 2 }
 0x21a   : > { %v534_v25 = vadd.f32 %v533_v24, %v532_v23 }
 0x21c   : > { %v535_v26 = vrot.slane %v534_v25, 1 }
 0x21e   : > { %v536_v28 = vadd.f32 %v535_v26, %v534_v25 }
 0x220   : > { %v537_v29 = vadd.f32 %v536_v28, %v529_v27 }
 0x222   : > { %538 = vst [vmem:[#allocation2] sm:$0x1] %v537_v29 }
 0x229   : > { %v542_v30 = vld [vmem:[#allocation2] sm:$0x1] }
 0x22a   : > { %v543_v31 = vmul.f32 0.0625, %v542_v30 }
 0x22c   : > { %854 = vmatmul.mubr.f32.vlgmr.msra.gmra.mrb[2].mxu0 %v543_v31 }
 0x2ff   : > { %v627_v33 = vpop.f32.mrb[2].mxu0 }
 0x300   : > { %v628_v34 = vadd.f32 %v627_v33, %v560_v32  ;;  %v855_v35 = vpop.f32.mrb[3].mxu0 }
 0x302   : > { %632 = vst.msk [vmem:[%s311_s18] sm:$0x1] %vm631_vm2, %v628_v34 }
 0x303   : > { %1034 = shalt.err (!%p1031_p5)
}
 0x304   : > { %s1035_s20 = scalar_lea.hbm %s1390_s11, 16  ;;  %s1039_s10 = scalar_lea.hbm %s1446_s7, 32 }
 0x305   : > { %p1036_p4 = scmp.ne.s32.totalorder %s1390_s11, %s1035_s20  ;;  %p1040_p12 = scmp.lt.u32.totalorder %s1390_s11, %s1446_s7 }
 0x306   : > { %p1041_p1 = scmp.lt.u32.totalorder %s1039_s10, %s1035_s20  ;;  %p1043_p8 = scmp.lt.u32.totalorder %s1035_s20, %s1390_s11 }
 0x307   : > { %p1037_p7 = pnand %p1036_p4, %p1454_p9 }
 0x308   : > { %p1042_p3 = por %p1041_p1, %p1040_p12 }
 0x309   : > { %p1038_p10 = pneg %p1037_p7 }
 0x30a   : > { %p1044_p11 = por %p1043_p8, %p1042_p3 }
 0x30c   : > { %p1045_p0 = pnand %p1044_p11, %p1038_p10 }
 0x30e   : > { %1048 = shalt.err (!%p1045_p0)
}
 0x30f   : > { %918 = dma.vmem_to_hbm [thread:$0]  (%p1454_p9), %s1392_s19, 16, %s1390_s11, %s634_s23  }
 0x310 PF: > { %s658_s13 = sand.u32 1, %s1083_s24   ;;  %p1455_p6 = scmp.ne.s32.totalorder %s1451_s16, 0 }
 0x311   : > { %p1456_p13 = scmp.ge.s32.totalorder %s1103_s29, 2  ;;  %s659_s21 = scalar_lea.sflag [#allocation5], %s658_s13 }
 0x313   : > { %p925_p2 = pnand %p1456_p13, %p1455_p6 }
 0x315   : > { %1078 = dma.done.wait (!%p925_p2), %s659_s21, 16  }
 0x316   : > { %1080 = vsyncadd (!%p925_p2), %s659_s21, 4294967280  ;;  %s23_s29 = sadd.s32 1, %s1103_s29   ;;  %s1457_s24 = smov %s1087_s25 }
 0x317   : > { %p20_p5 = scmp.ge.s32.totalorder %s23_s29, 4   ;;  %s1458_s25 = smov %s1091_s26 }
 0x318   : > { %s1459_s26 = smov %s1208_s15  ;;  %s1460_s27 = smov %s1099_s28 }
 0x319   : > { %s1461_s28 = smov %s1463_s9  ;;  %22 = sbr.rel (!%p20_p5) target bundleno = 6 (0x6), region = 101 }
 0x320   :  { %663 = vsyncpa [#allocation4], 1 }
 0x321   :  { %665 = vsyncpa [#allocation4 + $0x1], 1 }
 0x322   :  { %666 = vsyncpa [#allocation5], 1 }
 0x323   :  { %668 = vsyncpa [#allocation5 + $0x1], 1 }

</bundles_post_ra>
